<compile_context>
chip_gen: v7x
topology: tpu7x:2x2x1
jax: 0.10.0
libtpu: 0.0.40
codegen_flags: <defaults>
</compile_context>

<pallas_src>
import jax
import jax.numpy as jnp
from jax.experimental import pallas as pl
from jax.experimental.pallas import tpu as pltpu


def _sublane_pack(itemsize: int) -> int:
    # rows per vreg sublane group for this dtype width
    return {1: 32, 2: 16}.get(int(itemsize), 8)


def _vmem_config():
    """Generation-aware scoped-VMEM limit and tile budget (bytes)."""
    cap = 64 * 1024 * 1024  # conservative fallback (v7x physical VMEM)
    try:
        cap = int(pltpu.get_tpu_info().vmem_capacity_bytes)
    except Exception:
        pass
    # <= 96 MiB on 128 MiB parts (v5e/v6e), <= 48 MiB on 64 MiB parts (v7x).
    vmem_limit = max(32 * 1024 * 1024, min(cap * 3 // 4, 96 * 1024 * 1024))
    tile_budget = vmem_limit * 3 // 4  # headroom for output blocks / compiler scratch
    return vmem_limit, tile_budget


def _choose_tile_rows(batch: int, num_classes: int, itemsizes, tile_budget: int) -> int:
    """Largest sublane-aligned batch tile that fits the VMEM budget."""
    pack = max(_sublane_pack(s) for s in itemsizes)
    # 2 pipeline buffers per [*, C] input (native dtype) + ~6 live [TB,C] f32 temps.
    per_row = num_classes * (2 * sum(int(s) for s in itemsizes) + 6 * 4) + 32
    tb = tile_budget // max(per_row, 1)
    tb = max(pack, min(tb, 8192))          # cap raised from 1024 -> 8192
    if tb >= batch:
        if batch > 2 * pack:
            # Keep >= 2 tiles so a 2-TC chip (v7x) can split the batch axis.
            half = -(-batch // 2)
            return min(batch, -(-half // pack) * pack)
        return batch                       # single tile covers the whole batch
    return max(pack, (tb // pack) * pack)  # sublane/pack aligned


def _make_lsd_partial_kernel(tau: float, beta: float, batch: int, tile_rows: int):
    inv_tau = 1.0 / float(tau)
    beta = float(beta)

    def kernel(logits_ref, xtgt_ref, dg_ref, out_ref):
        i = pl.program_id(0)
        x = logits_ref[...].astype(jnp.float32)         # [TB, C]
        dg = dg_ref[...].astype(jnp.float32)            # [TB, C]
        x_tgt = xtgt_ref[...]                           # [TB, 1] f32 (gathered in wrapper)
        tb = x.shape[0]

        # Validity mask for the (possibly partial) last tile.  Keep this a
        # select (NOT a multiply-by-mask): padded rows may produce inf/NaN.
        row_ids = i * tile_rows + jax.lax.broadcasted_iota(jnp.int32, (tb, 1), 0)
        valid = row_ids < batch                         # [TB, 1]

        # ---- cross-entropy: ce = m + lse - x[target] -----------------------
        m = jnp.max(x, axis=1, keepdims=True)           # [TB, 1]
        xm = x - m                                      # [TB, C]
        lse = jnp.log(jnp.sum(jnp.exp(xm), axis=1, keepdims=True))
        ce_rows = m + lse - x_tgt                       # [TB, 1]

        # ---- fused tau-scaled KL (batchmean, no tau^2 — matches the module) -
        #   p = softmax(dg/tau), log q = log_softmax(x/tau)
        #   sum_c p_c (log p_c - log q_c)
        #     = (1/sd) * sum_c ed_c (zd_c - zt_c) + log st - log sd
        # (uses sum_c p_c = 1; no [TB,C] log-prob / prob tensors needed)
        md = jnp.max(dg, axis=1, keepdims=True)         # [TB, 1]
        zt = xm * inv_tau                               # [TB, C]  (max(x/tau) = m/tau)
        zd = (dg - md) * inv_tau                        # [TB, C]
        ed = jnp.exp(zd)                                # [TB, C]
        st = jnp.sum(jnp.exp(zt), axis=1, keepdims=True)   # [TB, 1], >= 1
        sd = jnp.sum(ed, axis=1, keepdims=True)             # [TB, 1], >= 1
        wsum = jnp.sum(ed * (zd - zt), axis=1, keepdims=True)
        kl_rows = wsum * pl.reciprocal(sd, approx=False) + jnp.log(st) - jnp.log(sd)

        partial = jnp.sum(jnp.where(valid, ce_rows + beta * kl_rows, 0.0))
        # Lane-dense unmasked store; wrapper reads [:, 0, 0].
        out_ref[...] = jnp.broadcast_to(partial, (1, 8, 128)).astype(jnp.float32)

    return kernel


def lsd_loss(logits, targets, dg_logits, *, num_classes=10, tau=3.0, beta=1.0):
    """JAX/Pallas equivalent of LSD_Loss.forward.

    logits:    [B, C] float (any float dtype; upcast to f32 in-kernel)
    targets:   [B]    int class indices
    dg_logits: [B, C] float (teacher logits)
    returns scalar float32 loss
    """
    del num_classes  # implied by logits.shape[1]
    B, C = logits.shape

    # Gather the target logit in the wrapper (touches only B elements) so the
    # kernel needs no iota/compare/select and no int32 targets DMA.
    x_target = jnp.take_along_axis(
        logits, targets.reshape(B, 1).astype(jnp.int32), axis=1
    ).astype(jnp.float32)                                # [B, 1]

    itemsizes = (jnp.dtype(logits.dtype).itemsize, jnp.dtype(dg_logits.dtype).itemsize)
    vmem_limit, tile_budget = _vmem_config()
    tb = _choose_tile_rows(B, C, itemsizes, tile_budget)
    num_tiles = pl.cdiv(B, tb)

    bytes_accessed = B * C * sum(itemsizes) + B * 4 + num_tiles * 8 * 128 * 4
    cost = pl.CostEstimate(flops=16 * B * C, transcendentals=3 * B * C,
                           bytes_accessed=bytes_accessed)

    partials = pl.pallas_call(
        _make_lsd_partial_kernel(float(tau), float(beta), B, tb),
        out_shape=jax.ShapeDtypeStruct((num_tiles, 8, 128), jnp.float32),
        grid_spec=pltpu.PrefetchScalarGridSpec(
            num_scalar_prefetch=0,
            grid=(num_tiles,),
            in_specs=[
                pl.BlockSpec((tb, C), lambda i: (i, 0)),   # student logits tile
                pl.BlockSpec((tb, 1), lambda i: (i, 0)),   # gathered target logits
                pl.BlockSpec((tb, C), lambda i: (i, 0)),   # teacher logits tile
            ],
            out_specs=pl.BlockSpec((1, 8, 128), lambda i: (i, 0, 0)),
        ),
        compiler_params=pltpu.CompilerParams(
            dimension_semantics=("parallel",),   # independent tiles; safe on all gens
            vmem_limit_bytes=vmem_limit,         # generation-aware scoped-VMEM limit
        ),
        cost_estimate=cost,
    )(logits, x_target, dg_logits)

    return jnp.sum(partials[:, 0, 0]) / B


def _reference_lsd_loss(logits, targets, dg_logits, tau=3.0, beta=1.0):
    """Pure-JAX reference matching the PyTorch module (NaN-safe teacher log)."""
    B = logits.shape[0]
    logp = jax.nn.log_softmax(logits, axis=1)
    ce = -jnp.mean(jnp.take_along_axis(logp, targets[:, None], axis=1))
    pred_logp = jax.nn.log_softmax(logits / tau, axis=1)
    dg_logp = jax.nn.log_softmax(dg_logits / tau, axis=1)
    dg_probs = jnp.exp(dg_logp)
    kld = jnp.sum(dg_probs * (dg_logp - pred_logp)) / B
    return ce + beta * kld


if __name__ == "__main__":
    key = jax.random.PRNGKey(0)
    k1, k2, k3 = jax.random.split(key, 3)

    B, C = 8, 10          # batch=8, num_classes=10 (module default)
    tau, beta = 3.0, 1.0

    logits = jax.random.normal(k1, (B, C), dtype=jnp.float32)
    dg_logits = jax.random.normal(k2, (B, C), dtype=jnp.float32)
    targets = jax.random.randint(k3, (B,), 0, C, dtype=jnp.int32)

    loss = lsd_loss(logits, targets, dg_logits, num_classes=C, tau=tau, beta=beta)
    loss = jax.block_until_ready(loss)

    ref = _reference_lsd_loss(logits, targets, dg_logits, tau=tau, beta=beta)
    assert jnp.allclose(loss, ref, rtol=1e-5, atol=1e-5), (loss, ref)

    print("KERNEL_OK")
</pallas_src>

<mosaic_0001>
module attributes {stable_mosaic.version = 11 : i64} {
  func.func @kernel(%arg0: i32, %arg1: memref<8x10xf32, #tpu.memory_space<vmem>>, %arg2: memref<8x1xf32, #tpu.memory_space<vmem>>, %arg3: memref<8x10xf32, #tpu.memory_space<vmem>>, %arg4: memref<1x8x128xf32, #tpu.memory_space<vmem>>) attributes {dimension_semantics = [#tpu.dimension_semantics<parallel>], iteration_bounds = array<i64: 1>, scalar_prefetch = 0 : i64, scratch_operands = 0 : i64, tpu.core_type = #tpu.core_type<tc>, window_params = [{transform_indices = @transform_0, window_bounds = array<i64: 8, 10>}, {transform_indices = @transform_1, window_bounds = array<i64: 8, 1>}, {transform_indices = @transform_2, window_bounds = array<i64: 8, 10>}, {transform_indices = @transform_3, window_bounds = array<i64: 1, 8, 128>}]} {
    %c0 = arith.constant 0 : index
    %c0_0 = arith.constant 0 : index
    %0 = vector.load %arg1[%c0, %c0_0] : memref<8x10xf32, #tpu.memory_space<vmem>>, vector<8x10xf32>
    %c0_1 = arith.constant 0 : index
    %c0_2 = arith.constant 0 : index
    %1 = vector.load %arg3[%c0_1, %c0_2] : memref<8x10xf32, #tpu.memory_space<vmem>>, vector<8x10xf32>
    %c0_3 = arith.constant 0 : index
    %c0_4 = arith.constant 0 : index
    %2 = vector.load %arg2[%c0_3, %c0_4] : memref<8x1xf32, #tpu.memory_space<vmem>>, vector<8x1xf32>
    %c8_i32 = arith.constant 8 : i32
    %3 = arith.muli %arg0, %c8_i32 : i32
    %4 = tpu.iota {dimensions = array<i32: 0>} : vector<8x1xi32>
    %5 = vector.broadcast %3 : i32 to vector<8x1xi32>
    %6 = arith.addi %5, %4 : vector<8x1xi32>
    %c8_i32_5 = arith.constant 8 : i32
    %7 = vector.broadcast %c8_i32_5 : i32 to vector<8x1xi32>
    %8 = arith.cmpi slt, %6, %7 : vector<8x1xi32>
    %cst = arith.constant dense<0xFF800000> : vector<8xf32>
    %9 = vector.multi_reduction <maximumf>, %0, %cst [1] : vector<8x10xf32> to vector<8xf32>
    %10 = vector.shape_cast %9 : vector<8xf32> to vector<8x1xf32>
    %11 = vector.broadcast %10 : vector<8x1xf32> to vector<8x10xf32>
    %12 = arith.subf %0, %11 : vector<8x10xf32>
    %13 = math.exp %12 : vector<8x10xf32>
    %cst_6 = arith.constant dense<0.000000e+00> : vector<8xf32>
    %14 = vector.multi_reduction <add>, %13, %cst_6 [1] : vector<8x10xf32> to vector<8xf32>
    %15 = vector.shape_cast %14 : vector<8xf32> to vector<8x1xf32>
    %16 = math.log %15 : vector<8x1xf32>
    %17 = arith.addf %10, %16 : vector<8x1xf32>
    %18 = arith.subf %17, %2 : vector<8x1xf32>
    %cst_7 = arith.constant dense<0xFF800000> : vector<8xf32>
    %19 = vector.multi_reduction <maximumf>, %1, %cst_7 [1] : vector<8x10xf32> to vector<8xf32>
    %20 = vector.shape_cast %19 : vector<8xf32> to vector<8x1xf32>
    %cst_8 = arith.constant 0.333333343 : f32
    %21 = vector.broadcast %cst_8 : f32 to vector<8x10xf32>
    %22 = arith.mulf %12, %21 : vector<8x10xf32>
    %23 = vector.broadcast %20 : vector<8x1xf32> to vector<8x10xf32>
    %24 = arith.subf %1, %23 : vector<8x10xf32>
    %cst_9 = arith.constant 0.333333343 : f32
    %25 = vector.broadcast %cst_9 : f32 to vector<8x10xf32>
    %26 = arith.mulf %24, %25 : vector<8x10xf32>
    %27 = math.exp %26 : vector<8x10xf32>
    %28 = math.exp %22 : vector<8x10xf32>
    %cst_10 = arith.constant dense<0.000000e+00> : vector<8xf32>
    %29 = vector.multi_reduction <add>, %28, %cst_10 [1] : vector<8x10xf32> to vector<8xf32>
    %30 = vector.shape_cast %29 : vector<8xf32> to vector<8x1xf32>
    %cst_11 = arith.constant dense<0.000000e+00> : vector<8xf32>
    %31 = vector.multi_reduction <add>, %27, %cst_11 [1] : vector<8x10xf32> to vector<8xf32>
    %32 = vector.shape_cast %31 : vector<8xf32> to vector<8x1xf32>
    %33 = arith.subf %26, %22 : vector<8x10xf32>
    %34 = arith.mulf %27, %33 : vector<8x10xf32>
    %cst_12 = arith.constant dense<0.000000e+00> : vector<8xf32>
    %35 = vector.multi_reduction <add>, %34, %cst_12 [1] : vector<8x10xf32> to vector<8xf32>
    %36 = vector.shape_cast %35 : vector<8xf32> to vector<8x1xf32>
    %37 = tpu.reciprocal %32 : vector<8x1xf32> -> vector<8x1xf32>
    %38 = arith.mulf %36, %37 : vector<8x1xf32>
    %39 = math.log %30 : vector<8x1xf32>
    %40 = arith.addf %38, %39 : vector<8x1xf32>
    %41 = math.log %32 : vector<8x1xf32>
    %42 = arith.subf %40, %41 : vector<8x1xf32>
    %cst_13 = arith.constant 1.000000e+00 : f32
    %43 = vector.broadcast %cst_13 : f32 to vector<8x1xf32>
    %44 = arith.mulf %43, %42 : vector<8x1xf32>
    %45 = arith.addf %18, %44 : vector<8x1xf32>
    %cst_14 = arith.constant 0.000000e+00 : f32
    %46 = vector.broadcast %cst_14 : f32 to vector<8x1xf32>
    %47 = arith.select %8, %45, %46 : vector<8x1xi1>, vector<8x1xf32>
    %48 = vector.shape_cast %47 : vector<8x1xf32> to vector<1x8x1xf32>
    %cst_15 = arith.constant dense<0.000000e+00> : vector<1xf32>
    %49 = vector.multi_reduction <add>, %48, %cst_15 [1, 2] : vector<1x8x1xf32> to vector<1xf32>
    %50 = vector.shape_cast %49 : vector<1xf32> to vector<1x1x1xf32>
    %51 = vector.extract %50[0, 0, 0] : f32 from vector<1x1x1xf32>
    %52 = vector.broadcast %51 : f32 to vector<1x8x128xf32>
    %c0_16 = arith.constant 0 : index
    %c0_17 = arith.constant 0 : index
    %c0_18 = arith.constant 0 : index
    %53 = vector.load %arg4[%c0_16, %c0_17, %c0_18] : memref<1x8x128xf32, #tpu.memory_space<vmem>>, vector<1x8x128xf32>
    tpu.vector_store %arg4[%c0_16, %c0_17, %c0_18], %52 {strides = array<i32>} : memref<1x8x128xf32, #tpu.memory_space<vmem>>, vector<1x8x128xf32>,
    return
  }
  func.func @transform_0(%arg0: i32) -> (i32, i32) {
    %c0_i32 = arith.constant 0 : i32
    %c0_i32_0 = arith.constant 0 : i32
    return %arg0, %c0_i32 : i32, i32
  }
  func.func @transform_1(%arg0: i32) -> (i32, i32) {
    %c0_i32 = arith.constant 0 : i32
    %c0_i32_0 = arith.constant 0 : i32
    return %arg0, %c0_i32 : i32, i32
  }
  func.func @transform_2(%arg0: i32) -> (i32, i32) {
    %c0_i32 = arith.constant 0 : i32
    %c0_i32_0 = arith.constant 0 : i32
    return %arg0, %c0_i32 : i32, i32
  }
  func.func @transform_3(%arg0: i32) -> (i32, i32, i32) {
    %c0_i32 = arith.constant 0 : i32
    %c0_i32_0 = arith.constant 0 : i32
    %c0_i32_1 = arith.constant 0 : i32
    return %arg0, %c0_i32, %c0_i32_0 : i32, i32, i32
  }
}

</mosaic_0001>

<bundles_post_ra>
// kernel: tpu_custom_call.1
= control target key start
LH: loop header
LB: loop body
LE: loop exit
PB: predicated region body
PF: predicated region fallthrough
CT: control target
= control target key end

     0   :  { %vm24_vm0 = vcmask 80896   ;;  %s185_s0 = inlined_call_operand.vmem [shape: f32[8,10], index: 0, kind: input, shape index: {}]   ;;  %s186_s1 = inlined_call_operand.vmem [shape: f32[8,1], index: 1, kind: input, shape index: {}]   ;;  %s187_s2 = inlined_call_operand.vmem [shape: f32[8,10], index: 2, kind: input, shape index: {}]   ;;  %s188_s3 = inlined_call_operand.hbm [shape: f32[1,8,128], index: 3, kind: output, shape index: {}]  }
   0x1   :  { %v15_v0 = vld [vmem:[%s185_s0] sm:$0xff] }
   0x2   :  { %v16_v1 = vld [vmem:[%s187_s2] sm:$0xff] }
   0x3   :  { %8 = vsyncpa [#allocation3], 0  ;;  %v25_v2 = vsel %vm24_vm0, %v15_v0, -inf  ;;  %v38_v3 = vsel %vm24_vm0, %v16_v1, -inf  ;;  %v17_v34 = vld [vmem:[%s186_s1] sm:$0xff]  ;;  %vm69_vm1 = vcmask 7168  }
   0x4   :  { %26 = vmax.xlane.f32.xlu0 %v25_v2  ;;  %s137_s16 = smov [#allocation2]  }
   0x5   :  { %s88_s17 = sshll.u32 %s137_s16, 4  ;;  %s89_s17 = int_to_ptr.vmem [resolvable:$true] %s88_s17 }
   0x6   :  { %s113_s1 = scalar_lea.vmem %s89_s17, 128  ;;  %p118_p1 = scmp.lt.s32.totalorder %s89_s17, %s89_s17 }
   0x7   :  { %p114_p0 = scmp.ne.s32.totalorder %s89_s17, %s113_s1  ;;  %p119_p2 = scmp.lt.s32.totalorder %s113_s1, %s113_s1 }
   0x8   :  { %39 = vmax.xlane.f32.xlu0 %v38_v3 }
   0x9   :  { %p120_p3 = por %p119_p2, %p118_p1 }
   0xb   :  { %p121_p4 = pnand %p120_p3, %p114_p0 }
  0x91   :  { %v27_v4 = vpop.xlane.xlu0 %26 }
  0x92   :  { %v28_v5 = vsub.f32 %v15_v0, %v27_v4 }
  0x94   :  { %v29_v6 = vmul.f32 1.442695, %v28_v5  ;;  %v41_v7 = vmul.f32 0.33333334, %v28_v5 }
  0x95   :  { %v40_v8 = vpop.xlane.xlu0 %39 }
  0x96   :  { %99 = vpow2.f32 %v29_v6  ;;  %v46_v9 = vmul.f32 1.442695, %v41_v7  ;;  %v42_v10 = vsub.f32 %v16_v1, %v40_v8 }
  0x98   :  { %101 = vpow2.f32 %v46_v9  ;;  %v43_v11 = vmul.f32 0.33333334, %v42_v10 }
  0x9a   :  { %v44_v12 = vmul.f32 1.442695, %v43_v11  ;;  %v54_v16 = vsub.f32 %v43_v11, %v41_v7 }
  0x9c   :  { %103 = vpow2.f32 %v44_v12 }
  0xa0   :  { %v100_v13 = vpop.eup %99 }
  0xa1   :  { %v31_v14 = vsel %vm24_vm0, %v100_v13, 0.0 }
  0xa2   :  { %v102_v15 = vpop.eup %101  ;;  %32 = vadd.xlane.f32.xlu1 %v31_v14 }
  0xa3   :  { %v48_v17 = vsel %vm24_vm0, %v102_v15, 0.0 }
  0xa6   :  { %v104_v18 = vpop.eup %103  ;;  %49 = vadd.xlane.f32.xlu1 %v48_v17 }
  0xa7   :  { %v51_v19 = vsel %vm24_vm0, %v104_v18, 0.0  ;;  %v55_v20 = vmul.f32 %v104_v18, %v54_v16 }
  0xa8   :  { %52 = vadd.xlane.f32.xlu0 %v51_v19 }
  0xa9   :  { %v56_v21 = vsel %vm24_vm0, %v55_v20, 0.0 }
  0xaa   :  { %57 = vadd.xlane.f32.xlu1 %v56_v21 }
 0x12f   :  { %v33_v22 = vpop.xlane.xlu1 %32 }
 0x130   :  { %105 = vlog2.f32 %v33_v22 }
 0x133   :  { %v50_v23 = vpop.xlane.xlu1 %49 }
 0x134   :  { %107 = vlog2.f32 %v50_v23 }
 0x135   :  { %v53_v24 = vpop.xlane.xlu0 %52 }
 0x136   :  { %109 = vrcp.f32 %v53_v24 }
 0x137   :  { %111 = vlog2.f32 %v53_v24  ;;  %v58_v29 = vpop.xlane.xlu1 %57 }
 0x13a   :  { %v106_v25 = vpop.eup %105 }
 0x13b   :  { %v35_v26 = vmul.f32 0.6931472, %v106_v25 }
 0x13d   :  { %v36_v31 = vadd.f32 %v35_v26, %v27_v4 }
 0x13e   :  { %v108_v27 = vpop.eup %107 }
 0x13f   :  { %v62_v32 = vmul.f32 0.6931472, %v108_v27  ;;  %v37_v37 = vsub.f32 %v36_v31, %v17_v34 }
 0x140   :  { %v110_v28 = vpop.eup %109 }
 0x141   :  { %v112_v30 = vpop.eup %111  ;;  %v60_v33 = vmul.f32 %v110_v28, %v58_v29 }
 0x142   :  { %v65_v35 = vmul.f32 0.6931472, %v112_v30 }
 0x143   :  { %v63_v36 = vadd.f32 %v62_v32, %v60_v33 }
 0x145   :  { %v66_v38 = vsub.f32 %v63_v36, %v65_v35 }
 0x147   :  { %v67_v39 = vadd.f32 %v66_v38, %v37_v37 }
 0x149   :  { %v70_v40 = vsel %vm69_vm1, %v67_v39, 0.0 }
 0x14a   :  { %71 = vadd.xlane.f32.xlu0 %v70_v40 }
 0x1d7   :  { %v72_v41 = vpop.xlane.xlu0 %71 }
 0x1d8   :  { %v73_v42 = vrot.slane %v72_v41, 4 }
 0x1da   :  { %v74_v43 = vadd.f32 %v73_v42, %v72_v41 }
 0x1dc   :  { %v75_v44 = vrot.slane %v74_v43, 2 }
 0x1de   :  { %v76_v45 = vadd.f32 %v75_v44, %v74_v43 }
 0x1e0   :  { %v77_v46 = vrot.slane %v76_v45, 1 }
 0x1e2   :  { %v78_v47 = vadd.f32 %v77_v46, %v76_v45 }
 0x1e4   :  { %96 = vpush %v78_v47 }
 0x215   :  { %s97_s18 = spop %96 }
 0x216   :  { %v80_v48 = vstv %s97_s18 }
 0x217   :  { %81 = vst [vmem:[#allocation2] sm:$0xff] %v80_v48 }
 0x218   :  { %124 = shalt.err (!%p121_p4)
}
 0x219   :  { %s125_s21 = scalar_lea.hbm %s188_s3, 128 }
 0x21a   :  { %p126_p5 = scmp.ne.s32.totalorder %s188_s3, %s125_s21  ;;  %p129_p6 = scmp.lt.u32.totalorder %s125_s21, %s188_s3 }
 0x21c   :  { %p131_p7 = pnand %p129_p6, %p126_p5 }
 0x21e   :  { %134 = shalt.err (!%p131_p7)
}
 0x21f   :  { %91 = dma.vmem_to_hbm [thread:$0]  %s89_s17, 128, %s188_s3, [#allocation3]  }
 0x220   :  { %135 = dma.done.wait [#allocation3], 128  }
 0x221   :  { %136 = vsyncadd [#allocation3], 4294967168 }
 0x222   :  { %95 = vsyncpa [#allocation3], 1 }

</bundles_post_ra>
